<compile_context>
chip_gen: v5e
topology: v5e:2x2
jax: 0.10.0
libtpu: 0.0.40
codegen_flags: <defaults>
</compile_context>

<pallas_src>
import jax
import jax.numpy as jnp
from jax.experimental import pallas as pl
from jax.experimental.pallas import tpu as pltpu


def _sigmoid(x):
    # tanh-form sigmoid: runs on the EUP (tanh) instead of a VALU divide.
    return 0.5 * (jnp.tanh(0.5 * x) + 1.0)


def _lstm_body(x_ref, w0_ref, wr_ref, b_ref, fcw_ref, fcb_ref, out_ref,
               num_layers):
    """Single-timestep stacked LSTM (zero initial state) + linear head.

    x_ref   : (B, input_dim)
    w0_ref  : (3, input_dim, H)      layer-0 W_ih^T blocks, gate order (i, g, o)
    wr_ref  : (3*(L-1), H, H) | None layers 1..L-1 W_ih^T blocks, same order
    b_ref   : (3*L, 1, H)            combined b_ih + b_hh per kept gate
    fcw_ref : (H, num_classes)       pre-transposed
    fcb_ref : (1, num_classes)
    out_ref : (B, num_classes)
    """

    def layer(h_in, wref, wbase, bbase):
        def gate(g_idx):
            return (jnp.dot(h_in, wref[wbase + g_idx],
                            preferred_element_type=jnp.float32)
                    + b_ref[bbase + g_idx])          # (B, H)
        i = _sigmoid(gate(0))
        g = jnp.tanh(gate(1))
        o = _sigmoid(gate(2))
        c = i * g                                    # f * c_prev == 0 dropped
        return o * jnp.tanh(c)

    h = layer(x_ref[...], w0_ref, 0, 0)              # layer 0
    for l in range(1, num_layers):                   # static unroll (L tiny)
        h = layer(h, wr_ref, 3 * (l - 1), 3 * l)

    out_ref[...] = (jnp.dot(h, fcw_ref[...],
                            preferred_element_type=jnp.float32)
                    + fcb_ref[...])


def _make_kernel(num_layers):
    if num_layers > 1:
        def kernel(x_ref, w0_ref, wr_ref, b_ref, fcw_ref, fcb_ref, out_ref):
            _lstm_body(x_ref, w0_ref, wr_ref, b_ref, fcw_ref, fcb_ref, out_ref,
                       num_layers)
    else:
        def kernel(x_ref, w0_ref, b_ref, fcw_ref, fcb_ref, out_ref):
            _lstm_body(x_ref, w0_ref, None, b_ref, fcw_ref, fcb_ref, out_ref,
                       num_layers)
    return kernel


def lstm_model_forward(x, packed, *, num_layers, hidden_dim, num_classes):
    B = x.shape[0]
    w0, wr, b_all, fc_w_t, fc_b = packed
    kernel = _make_kernel(num_layers)
    vmem = pl.BlockSpec(memory_space=pltpu.MemorySpace.VMEM)
    args = [x, w0] + ([wr] if num_layers > 1 else []) + [b_all, fc_w_t, fc_b]
    return pl.pallas_call(
        kernel,
        out_shape=jax.ShapeDtypeStruct((B, num_classes), jnp.float32),
        in_specs=[vmem] * len(args),
        out_specs=vmem,
    )(*args)


# ----------------------------------------------------------------------------
# Host-side parameter handling (PyTorch-layout params -> packed kernel operands)
# ----------------------------------------------------------------------------

def init_params(key, input_dim, hidden_dim, num_layers, num_classes):
    """PyTorch-layout params with uniform(-1/sqrt(H), 1/sqrt(H)) init."""
    H = hidden_dim
    bound = 1.0 / float(jnp.sqrt(H))
    keys = jax.random.split(key, 4 * num_layers + 2)

    def u(k, shape):
        return jax.random.uniform(k, shape, jnp.float32, -bound, bound)

    w_ih, w_hh, b_ih, b_hh = [], [], [], []
    for l in range(num_layers):
        in_l = input_dim if l == 0 else H
        w_ih.append(u(keys[4 * l + 0], (4 * H, in_l)))   # gate order i,f,g,o
        w_hh.append(u(keys[4 * l + 1], (4 * H, H)))
        b_ih.append(u(keys[4 * l + 2], (4 * H,)))
        b_hh.append(u(keys[4 * l + 3], (4 * H,)))
    fc_w = u(keys[-2], (num_classes, H))
    fc_b = u(keys[-1], (num_classes,))
    return dict(w_ih=w_ih, w_hh=w_hh, b_ih=b_ih, b_hh=b_hh,
                fc_w=fc_w, fc_b=fc_b)


def pack_params(params, *, hidden_dim, num_layers):
    """Drop W_hh and the f-gate, transpose, combine biases, coalesce operands."""
    H = hidden_dim
    gate_rows = (0, 2, 3)            # PyTorch order (i, f, g, o): keep i, g, o

    w0_blocks, wr_blocks, b_blocks = [], [], []
    for l in range(num_layers):
        w_ih = params["w_ih"][l]                          # (4H, in_l)
        bias = params["b_ih"][l] + params["b_hh"][l]      # (4H,) combined
        dst = w0_blocks if l == 0 else wr_blocks
        for gr in gate_rows:
            dst.append(w_ih[gr * H:(gr + 1) * H, :].T)    # (in_l, H) transposed
            b_blocks.append(bias[gr * H:(gr + 1) * H][None, :])   # (1, H)

    w0 = jnp.stack(w0_blocks)                             # (3, input_dim, H)
    wr = jnp.stack(wr_blocks) if num_layers > 1 else None # (3(L-1), H, H)
    b_all = jnp.stack(b_blocks)                           # (3L, 1, H)
    fc_w_t = params["fc_w"].T                             # (H, C)
    fc_b = params["fc_b"][None, :]                        # (1, C)
    return w0, wr, b_all, fc_w_t, fc_b


def reference_forward(x, params, *, num_layers, hidden_dim):
    """Pure-JAX reference of the full PyTorch forward (all 4 gates, W_hh kept)."""
    H = hidden_dim
    B = x.shape[0]
    h_in = x
    for l in range(num_layers):
        w_ih = params["w_ih"][l]
        w_hh = params["w_hh"][l]
        bias = params["b_ih"][l] + params["b_hh"][l]
        h0 = jnp.zeros((B, H), jnp.float32)
        c0 = jnp.zeros((B, H), jnp.float32)
        gates = h_in @ w_ih.T + h0 @ w_hh.T + bias
        i = jax.nn.sigmoid(gates[:, 0 * H:1 * H])
        f = jax.nn.sigmoid(gates[:, 1 * H:2 * H])
        g = jnp.tanh(gates[:, 2 * H:3 * H])
        o = jax.nn.sigmoid(gates[:, 3 * H:4 * H])
        c = f * c0 + i * g
        h_in = o * jnp.tanh(c)
    return h_in @ params["fc_w"].T + params["fc_b"]


if __name__ == "__main__":
    B, INPUT_DIM, HIDDEN, LAYERS, CLASSES = 8, 16, 32, 2, 8

    key = jax.random.PRNGKey(0)
    kx, kp = jax.random.split(key)
    x = jax.random.normal(kx, (B, INPUT_DIM), jnp.float32)

    params = init_params(kp, INPUT_DIM, HIDDEN, LAYERS, CLASSES)
    packed = pack_params(params, hidden_dim=HIDDEN, num_layers=LAYERS)

    out = lstm_model_forward(x, packed, num_layers=LAYERS, hidden_dim=HIDDEN,
                             num_classes=CLASSES)
    out = jax.block_until_ready(out)

    ref = reference_forward(x, params, num_layers=LAYERS, hidden_dim=HIDDEN)
    assert out.shape == (B, CLASSES)
    assert jnp.allclose(out, ref, atol=1e-5, rtol=1e-5), "mismatch vs reference"

    print("KERNEL_OK")
</pallas_src>

<mosaic_0001>
module attributes {stable_mosaic.version = 11 : i64} {
  func.func @kernel(%arg0: memref<8x16xf32, #tpu.memory_space<vmem>>, %arg1: memref<3x16x32xf32, #tpu.memory_space<vmem>>, %arg2: memref<3x32x32xf32, #tpu.memory_space<vmem>>, %arg3: memref<6x1x32xf32, #tpu.memory_space<vmem>>, %arg4: memref<32x8xf32, #tpu.memory_space<vmem>>, %arg5: memref<1x8xf32, #tpu.memory_space<vmem>>, %arg6: memref<8x8xf32, #tpu.memory_space<vmem>>) attributes {dimension_semantics = [], scalar_prefetch = 0 : i64, scratch_operands = 0 : i64, tpu.core_type = #tpu.core_type<tc>} {
    %c0 = arith.constant 0 : index
    %c0_0 = arith.constant 0 : index
    %0 = vector.load %arg0[%c0, %c0_0] : memref<8x16xf32, #tpu.memory_space<vmem>>, vector<8x16xf32>
    %c0_1 = arith.constant 0 : index
    %c0_2 = arith.constant 0 : index
    %c0_3 = arith.constant 0 : index
    %1 = vector.load %arg1[%c0_1, %c0_2, %c0_3] : memref<3x16x32xf32, #tpu.memory_space<vmem>>, vector<1x16x32xf32>
    %2 = vector.shape_cast %1 : vector<1x16x32xf32> to vector<16x32xf32>
    %cst = arith.constant dense<0.000000e+00> : vector<8x32xf32>
    %3 = tpu.matmul %0, %2, %cst {dimension_numbers = #tpu.dot_dimension_numbers<[1], [0], [0], [1], [0, 0, 1, 1], [], []>} : vector<8x16xf32>, vector<16x32xf32>, vector<8x32xf32> -> vector<8x32xf32>
    %c0_4 = arith.constant 0 : index
    %c0_5 = arith.constant 0 : index
    %c0_6 = arith.constant 0 : index
    %4 = vector.load %arg3[%c0_4, %c0_5, %c0_6] : memref<6x1x32xf32, #tpu.memory_space<vmem>>, vector<1x1x32xf32>
    %5 = vector.shape_cast %4 : vector<1x1x32xf32> to vector<1x32xf32>
    %6 = vector.broadcast %5 : vector<1x32xf32> to vector<8x32xf32>
    %7 = arith.addf %3, %6 : vector<8x32xf32>
    %cst_7 = arith.constant 5.000000e-01 : f32
    %8 = vector.broadcast %cst_7 : f32 to vector<8x32xf32>
    %9 = arith.mulf %8, %7 : vector<8x32xf32>
    %10 = math.tanh %9 : vector<8x32xf32>
    %cst_8 = arith.constant 1.000000e+00 : f32
    %11 = vector.broadcast %cst_8 : f32 to vector<8x32xf32>
    %12 = arith.addf %10, %11 : vector<8x32xf32>
    %cst_9 = arith.constant 5.000000e-01 : f32
    %13 = vector.broadcast %cst_9 : f32 to vector<8x32xf32>
    %14 = arith.mulf %13, %12 : vector<8x32xf32>
    %c1 = arith.constant 1 : index
    %c0_10 = arith.constant 0 : index
    %c0_11 = arith.constant 0 : index
    %15 = vector.load %arg1[%c1, %c0_10, %c0_11] : memref<3x16x32xf32, #tpu.memory_space<vmem>>, vector<1x16x32xf32>
    %16 = vector.shape_cast %15 : vector<1x16x32xf32> to vector<16x32xf32>
    %cst_12 = arith.constant dense<0.000000e+00> : vector<8x32xf32>
    %17 = tpu.matmul %0, %16, %cst_12 {dimension_numbers = #tpu.dot_dimension_numbers<[1], [0], [0], [1], [0, 0, 1, 1], [], []>} : vector<8x16xf32>, vector<16x32xf32>, vector<8x32xf32> -> vector<8x32xf32>
    %c1_13 = arith.constant 1 : index
    %c0_14 = arith.constant 0 : index
    %c0_15 = arith.constant 0 : index
    %18 = vector.load %arg3[%c1_13, %c0_14, %c0_15] : memref<6x1x32xf32, #tpu.memory_space<vmem>>, vector<1x1x32xf32>
    %19 = vector.shape_cast %18 : vector<1x1x32xf32> to vector<1x32xf32>
    %20 = vector.broadcast %19 : vector<1x32xf32> to vector<8x32xf32>
    %21 = arith.addf %17, %20 : vector<8x32xf32>
    %22 = math.tanh %21 : vector<8x32xf32>
    %c2 = arith.constant 2 : index
    %c0_16 = arith.constant 0 : index
    %c0_17 = arith.constant 0 : index
    %23 = vector.load %arg1[%c2, %c0_16, %c0_17] : memref<3x16x32xf32, #tpu.memory_space<vmem>>, vector<1x16x32xf32>
    %24 = vector.shape_cast %23 : vector<1x16x32xf32> to vector<16x32xf32>
    %cst_18 = arith.constant dense<0.000000e+00> : vector<8x32xf32>
    %25 = tpu.matmul %0, %24, %cst_18 {dimension_numbers = #tpu.dot_dimension_numbers<[1], [0], [0], [1], [0, 0, 1, 1], [], []>} : vector<8x16xf32>, vector<16x32xf32>, vector<8x32xf32> -> vector<8x32xf32>
    %c2_19 = arith.constant 2 : index
    %c0_20 = arith.constant 0 : index
    %c0_21 = arith.constant 0 : index
    %26 = vector.load %arg3[%c2_19, %c0_20, %c0_21] : memref<6x1x32xf32, #tpu.memory_space<vmem>>, vector<1x1x32xf32>
    %27 = vector.shape_cast %26 : vector<1x1x32xf32> to vector<1x32xf32>
    %28 = vector.broadcast %27 : vector<1x32xf32> to vector<8x32xf32>
    %29 = arith.addf %25, %28 : vector<8x32xf32>
    %cst_22 = arith.constant 5.000000e-01 : f32
    %30 = vector.broadcast %cst_22 : f32 to vector<8x32xf32>
    %31 = arith.mulf %30, %29 : vector<8x32xf32>
    %32 = math.tanh %31 : vector<8x32xf32>
    %cst_23 = arith.constant 1.000000e+00 : f32
    %33 = vector.broadcast %cst_23 : f32 to vector<8x32xf32>
    %34 = arith.addf %32, %33 : vector<8x32xf32>
    %cst_24 = arith.constant 5.000000e-01 : f32
    %35 = vector.broadcast %cst_24 : f32 to vector<8x32xf32>
    %36 = arith.mulf %35, %34 : vector<8x32xf32>
    %37 = arith.mulf %14, %22 : vector<8x32xf32>
    %38 = math.tanh %37 : vector<8x32xf32>
    %39 = arith.mulf %36, %38 : vector<8x32xf32>
    %c0_25 = arith.constant 0 : index
    %c0_26 = arith.constant 0 : index
    %c0_27 = arith.constant 0 : index
    %40 = vector.load %arg2[%c0_25, %c0_26, %c0_27] : memref<3x32x32xf32, #tpu.memory_space<vmem>>, vector<1x32x32xf32>
    %41 = vector.shape_cast %40 : vector<1x32x32xf32> to vector<32x32xf32>
    %cst_28 = arith.constant dense<0.000000e+00> : vector<8x32xf32>
    %42 = tpu.matmul %39, %41, %cst_28 {dimension_numbers = #tpu.dot_dimension_numbers<[1], [0], [0], [1], [0, 0, 1, 1], [], []>} : vector<8x32xf32>, vector<32x32xf32>, vector<8x32xf32> -> vector<8x32xf32>
    %c3 = arith.constant 3 : index
    %c0_29 = arith.constant 0 : index
    %c0_30 = arith.constant 0 : index
    %43 = vector.load %arg3[%c3, %c0_29, %c0_30] : memref<6x1x32xf32, #tpu.memory_space<vmem>>, vector<1x1x32xf32>
    %44 = vector.shape_cast %43 : vector<1x1x32xf32> to vector<1x32xf32>
    %45 = vector.broadcast %44 : vector<1x32xf32> to vector<8x32xf32>
    %46 = arith.addf %42, %45 : vector<8x32xf32>
    %cst_31 = arith.constant 5.000000e-01 : f32
    %47 = vector.broadcast %cst_31 : f32 to vector<8x32xf32>
    %48 = arith.mulf %47, %46 : vector<8x32xf32>
    %49 = math.tanh %48 : vector<8x32xf32>
    %cst_32 = arith.constant 1.000000e+00 : f32
    %50 = vector.broadcast %cst_32 : f32 to vector<8x32xf32>
    %51 = arith.addf %49, %50 : vector<8x32xf32>
    %cst_33 = arith.constant 5.000000e-01 : f32
    %52 = vector.broadcast %cst_33 : f32 to vector<8x32xf32>
    %53 = arith.mulf %52, %51 : vector<8x32xf32>
    %c1_34 = arith.constant 1 : index
    %c0_35 = arith.constant 0 : index
    %c0_36 = arith.constant 0 : index
    %54 = vector.load %arg2[%c1_34, %c0_35, %c0_36] : memref<3x32x32xf32, #tpu.memory_space<vmem>>, vector<1x32x32xf32>
    %55 = vector.shape_cast %54 : vector<1x32x32xf32> to vector<32x32xf32>
    %cst_37 = arith.constant dense<0.000000e+00> : vector<8x32xf32>
    %56 = tpu.matmul %39, %55, %cst_37 {dimension_numbers = #tpu.dot_dimension_numbers<[1], [0], [0], [1], [0, 0, 1, 1], [], []>} : vector<8x32xf32>, vector<32x32xf32>, vector<8x32xf32> -> vector<8x32xf32>
    %c4 = arith.constant 4 : index
    %c0_38 = arith.constant 0 : index
    %c0_39 = arith.constant 0 : index
    %57 = vector.load %arg3[%c4, %c0_38, %c0_39] : memref<6x1x32xf32, #tpu.memory_space<vmem>>, vector<1x1x32xf32>
    %58 = vector.shape_cast %57 : vector<1x1x32xf32> to vector<1x32xf32>
    %59 = vector.broadcast %58 : vector<1x32xf32> to vector<8x32xf32>
    %60 = arith.addf %56, %59 : vector<8x32xf32>
    %61 = math.tanh %60 : vector<8x32xf32>
    %c2_40 = arith.constant 2 : index
    %c0_41 = arith.constant 0 : index
    %c0_42 = arith.constant 0 : index
    %62 = vector.load %arg2[%c2_40, %c0_41, %c0_42] : memref<3x32x32xf32, #tpu.memory_space<vmem>>, vector<1x32x32xf32>
    %63 = vector.shape_cast %62 : vector<1x32x32xf32> to vector<32x32xf32>
    %cst_43 = arith.constant dense<0.000000e+00> : vector<8x32xf32>
    %64 = tpu.matmul %39, %63, %cst_43 {dimension_numbers = #tpu.dot_dimension_numbers<[1], [0], [0], [1], [0, 0, 1, 1], [], []>} : vector<8x32xf32>, vector<32x32xf32>, vector<8x32xf32> -> vector<8x32xf32>
    %c5 = arith.constant 5 : index
    %c0_44 = arith.constant 0 : index
    %c0_45 = arith.constant 0 : index
    %65 = vector.load %arg3[%c5, %c0_44, %c0_45] : memref<6x1x32xf32, #tpu.memory_space<vmem>>, vector<1x1x32xf32>
    %66 = vector.shape_cast %65 : vector<1x1x32xf32> to vector<1x32xf32>
    %67 = vector.broadcast %66 : vector<1x32xf32> to vector<8x32xf32>
    %68 = arith.addf %64, %67 : vector<8x32xf32>
    %cst_46 = arith.constant 5.000000e-01 : f32
    %69 = vector.broadcast %cst_46 : f32 to vector<8x32xf32>
    %70 = arith.mulf %69, %68 : vector<8x32xf32>
    %71 = math.tanh %70 : vector<8x32xf32>
    %cst_47 = arith.constant 1.000000e+00 : f32
    %72 = vector.broadcast %cst_47 : f32 to vector<8x32xf32>
    %73 = arith.addf %71, %72 : vector<8x32xf32>
    %cst_48 = arith.constant 5.000000e-01 : f32
    %74 = vector.broadcast %cst_48 : f32 to vector<8x32xf32>
    %75 = arith.mulf %74, %73 : vector<8x32xf32>
    %76 = arith.mulf %53, %61 : vector<8x32xf32>
    %77 = math.tanh %76 : vector<8x32xf32>
    %78 = arith.mulf %75, %77 : vector<8x32xf32>
    %c0_49 = arith.constant 0 : index
    %c0_50 = arith.constant 0 : index
    %79 = vector.load %arg4[%c0_49, %c0_50] : memref<32x8xf32, #tpu.memory_space<vmem>>, vector<32x8xf32>
    %cst_51 = arith.constant dense<0.000000e+00> : vector<8x8xf32>
    %80 = tpu.matmul %78, %79, %cst_51 {dimension_numbers = #tpu.dot_dimension_numbers<[1], [0], [0], [1], [0, 0, 1, 1], [], []>} : vector<8x32xf32>, vector<32x8xf32>, vector<8x8xf32> -> vector<8x8xf32>
    %c0_52 = arith.constant 0 : index
    %c0_53 = arith.constant 0 : index
    %81 = vector.load %arg5[%c0_52, %c0_53] : memref<1x8xf32, #tpu.memory_space<vmem>>, vector<1x8xf32>
    %82 = vector.broadcast %81 : vector<1x8xf32> to vector<8x8xf32>
    %83 = arith.addf %80, %82 : vector<8x8xf32>
    %c0_54 = arith.constant 0 : index
    %c0_55 = arith.constant 0 : index
    %84 = vector.load %arg6[%c0_54, %c0_55] : memref<8x8xf32, #tpu.memory_space<vmem>>, vector<8x8xf32>
    tpu.vector_store %arg6[%c0_54, %c0_55], %83 {strides = array<i32>} : memref<8x8xf32, #tpu.memory_space<vmem>>, vector<8x8xf32>,
    return
  }
}

</mosaic_0001>

<bundles_post_ra>
// kernel: tpu_custom_call.1
= control target key start
LH: loop header
LB: loop body
LE: loop exit
PB: predicated region body
PF: predicated region fallthrough
CT: control target
= control target key end

     0   :  { %11 = vsyncpa [#allocation3], 0  ;;  %s518_s0 = inlined_call_operand.vmem [shape: f32[8,16], index: 0, kind: input, shape index: {}]   ;;  %s519_s1 = inlined_call_operand.hbm [shape: f32[3,16,32], index: 1, kind: input, shape index: {}]   ;;  %s520_s2 = inlined_call_operand.hbm [shape: f32[3,32,32], index: 2, kind: input, shape index: {}]   ;;  %s521_s3 = inlined_call_operand.vmem [shape: f32[6,1,32], index: 3, kind: input, shape index: {}]   ;;  %s522_s4 = inlined_call_operand.vmem [shape: f32[32,8], index: 4, kind: input, shape index: {}]   ;;  %s523_s5 = inlined_call_operand.vmem [shape: f32[1,8], index: 5, kind: input, shape index: {}]   ;;  %s524_s6 = inlined_call_operand.hbm [shape: f32[8,8], index: 6, kind: output, shape index: {}]  }
   0x1   :  { %12 = vsyncpa [#allocation6], 0 }
   0x2   :  { %13 = vsyncpa [#allocation4], 0  ;;  %s20_s23 = sshll.u32 %s519_s1, 4  ;;  %s429_s24 = smov [#allocation2]   ;;  %s21_s23 = int_to_ptr.hbm [resolvable:$true] %s20_s23 }
   0x3   :  { %s22_s25 = sshll.u32 %s429_s24, 4  ;;  %s33_s28 = sshll.u32 %s520_s2, 4  ;;  %s23_s25 = int_to_ptr.vmem [resolvable:$true] %s22_s25  ;;  %s34_s28 = int_to_ptr.hbm [resolvable:$true] %s33_s28 }
   0x4   :  { %s430_s29 = smov 128   ;;  %s431_s30 = smov 8  }
   0x5   :  { %28 = dma.hbm_to_vmem [thread:$0]  %s21_s23, 768, %s23_s25, [#allocation3], %s430_s29, %s430_s29, %s431_s30  }
   0x6   :  { %s432_s7 = smov [#allocation5]  }
   0x7   :  { %s35_s8 = sshll.u32 %s432_s7, 4  ;;  %s36_s8 = int_to_ptr.vmem [resolvable:$true] %s35_s8 }
   0x8   :  { %41 = dma.hbm_to_vmem [thread:$0]  %s34_s28, 1536, %s36_s8, [#allocation6], %s430_s29, %s430_s29, %s431_s30  }
   0x9   :  { %423 = dma.done.wait [#allocation3], 768  }
   0xa   :  { %424 = vsyncadd [#allocation3], 4294966528 }
   0xb   :  { %425 = dma.done.wait [#allocation6], 1536  }
   0xc   :  { %426 = vsyncadd [#allocation6], 4294965760  ;;  %v58_v0 = vld [vmem:[#allocation2 + $0x8] sm:$0xff]  ;;  %v57_v1 = vld [vmem:[#allocation2] sm:$0xff]  ;;  %vm63_vm0 = vcmask 130048   ;;  %vm164_vm1 = vcmask 261120  }
   0xd   :  { %v56_v2 = vld [vmem:[%s518_s0] sm:$0xff]  ;;  %81 = vmatpush.msra.mxu0 %v58_v0  ;;  %v122_v3 = vld [vmem:[#allocation2 + $0x28] sm:$0xff]  ;;  %v93_v5 = vld [vmem:[#allocation2 + $0x18] sm:$0xff]  ;;  %s433_s28 = smov [#allocation7]   ;;  %s300_s8 = sshll.u32 %s524_s6, 4  ;;  %vm291_vm2 = vcmask 64512   ;;  %s301_s8 = int_to_ptr.hbm [resolvable:$true] %s300_s8 }
   0xe   :  { %v121_v4 = vld [vmem:[#allocation2 + $0x20] sm:$0xff]  ;;  %142 = vmatpush.msra.mxu2 %v122_v3  ;;  %113 = vmatpush.msra.mxu1 %v93_v5  ;;  %v92_v6 = vld [vmem:[#allocation2 + $0x10] sm:$0xff]  ;;  %v158_v7 = vld [vmem:[#allocation5 + $0x18] sm:$0xff]  ;;  %s298_s29 = sshll.u32 %s433_s28, 4  ;;  %s299_s29 = int_to_ptr.vmem [resolvable:$true] %s298_s29 }
   0xf   :  { %82 = vmatpush.msra.mxu0 %v57_v1  ;;  %v196_v8 = vld [vmem:[#allocation5 + $0x38] sm:$0xff]  ;;  %180 = vmatpush.msra.mxu3 %v158_v7  ;;  %v157_v10 = vld [vmem:[#allocation5 + $0x10] sm:$0xff]  ;;  %v156_v13 = vld [vmem:[#allocation5 + $0x8] sm:$0xff] }
  0x10   :  { %311 = vmatmul.msk.f32.vlgmr.msra.gmra.mxu0 %vm63_vm0, %v56_v2  ;;  %143 = vmatpush.msra.mxu2 %v121_v4  ;;  %v227_v9 = vld [vmem:[#allocation5 + $0x58] sm:$0xff]  ;;  %v195_v11 = vld [vmem:[#allocation5 + $0x30] sm:$0xff]  ;;  %v194_v14 = vld [vmem:[#allocation5 + $0x28] sm:$0xff] }
  0x11   :  { %315 = vmatmul.msk.f32.vlgmr.msra.gmra.mxu2 %vm63_vm0, %v56_v2  ;;  %114 = vmatpush.msra.mxu1 %v92_v6  ;;  %v226_v12 = vld [vmem:[#allocation5 + $0x50] sm:$0xff]  ;;  %v225_v15 = vld [vmem:[#allocation5 + $0x48] sm:$0xff]  ;;  %v155_v16 = vld [vmem:[#allocation5] sm:$0xff] }
  0x12   :  { %313 = vmatmul.msk.f32.vlgmr.msra.gmra.mxu1 %vm63_vm0, %v56_v2  ;;  %214 = vmatpush.msrb.mxu0 %v196_v8  ;;  %v193_v17 = vld [vmem:[#allocation5 + $0x20] sm:$0xff]  ;;  %v328_v19 = vld [vmem:[%s521_s3] ss:$0 sm:$0xff]  ;;  %v329_v20 = vld [vmem:[%s521_s3 + $0x1] ss:$0 sm:$0xff] }
  0x13   :  { %245 = vmatpush.msrb.mxu1 %v227_v9  ;;  %181 = vmatpush.msra.mxu3 %v157_v10  ;;  %v224_v18 = vld [vmem:[#allocation5 + $0x40] sm:$0xff]  ;;  %v330_v26 = vld [vmem:[%s521_s3 + $0x2] ss:$0 sm:$0xff]  ;;  %v263_v40 = vld [vmem:[%s522_s4 + $0x18] sm:$0xff] }
  0x14   :  { %215 = vmatpush.msrb.mxu0 %v195_v11  ;;  %v262_v41 = vld [vmem:[%s522_s4 + $0x10] sm:$0xff]  ;;  %283 = vmatpush.msrb.mxu2 %v263_v40  ;;  %v261_v42 = vld [vmem:[%s522_s4 + $0x8] sm:$0xff]  ;;  %v260_v43 = vld [vmem:[%s522_s4] sm:$0xff] }
  0x15   :  { %246 = vmatpush.msrb.mxu1 %v226_v12  ;;  %182 = vmatpush.msra.mxu3 %v156_v13  ;;  %v333_v44 = vld [vmem:[%s521_s3 + $0x3] ss:$0 sm:$0xff]  ;;  %v332_v45 = vld [vmem:[%s521_s3 + $0x5] ss:$0 sm:$0xff]  ;;  %v331_v48 = vld [vmem:[%s521_s3 + $0x4] ss:$0 sm:$0xff] }
  0x16   :  { %216 = vmatpush.msrb.mxu0 %v194_v14  ;;  %284 = vmatpush.msrb.mxu2 %v262_v41  ;;  %v334_v1 = vld [vmem:[%s523_s5] ss:$0 sm:$0xff] }
  0x17   :  { %247 = vmatpush.msrb.mxu1 %v225_v15  ;;  %183 = vmatpush.msra.mxu3 %v155_v16 }
  0x18   :  { %217 = vmatpush.msrb.mxu0 %v193_v17  ;;  %285 = vmatpush.msrb.mxu2 %v261_v42 }
  0x19   :  { %248 = vmatpush.msrb.mxu1 %v224_v18 }
  0x1a   :  { %286 = vmatpush.msrb.mxu2 %v260_v43 }
  0x8d   :  { %v84_v21 = vpop.f32.mrf.mxu0 }
  0x8e   :  { %v85_v22 = vadd.f32 %v328_v19, %v84_v21 }
  0x8f   :  { %v116_v23 = vpop.f32.mrf.mxu1 }
  0x90   :  { %v87_v24 = vmul.f32 0.5, %v85_v22  ;;  %v117_v25 = vadd.f32 %v329_v20, %v116_v23 }
  0x92   :  { %335 = vtanh.f32 %v87_v24 }
  0x93   :  { %337 = vtanh.f32 %v117_v25 }
  0x94   :  { %v145_v27 = vpop.f32.mrf.mxu2 }
  0x95   :  { %v146_v28 = vadd.f32 %v330_v26, %v145_v27 }
  0x97   :  { %v148_v29 = vmul.f32 0.5, %v146_v28 }
  0x98   :  { %v336_v30 = vpop.eup %335 }
  0x99   :  { %v89_v31 = vadd.f32 1.0, %v336_v30  ;;  %339 = vtanh.f32 %v148_v29  ;;  %v338_v32 = vpop.eup %337 }
  0x9b   :  { %v90_v33 = vmul.f32 0.5, %v89_v31 }
  0x9d   :  { %v152_v34 = vmul.f32 %v338_v32, %v90_v33 }
  0x9f   :  { %v340_v35 = vpop.eup %339  ;;  %341 = vtanh.f32 %v152_v34 }
  0xa0   :  { %v150_v36 = vadd.f32 1.0, %v340_v35 }
  0xa2   :  { %v151_v37 = vmul.f32 0.5, %v150_v36 }
  0xa5   :  { %v342_v38 = vpop.eup %341 }
  0xa6   :  { %v154_v39 = vmul.f32 %v342_v38, %v151_v37 }
  0xa8   :  { %317 = vmatmul.msk.f32.vlgmr.msra.gmra.mxu3 %vm164_vm1, %v154_v39  ;;  %319 = vmatmul.msk.f32.vlgmr.msrb.gmra.mxu0 %vm164_vm1, %v154_v39 }
  0xa9   :  { %321 = vmatmul.msk.f32.vlgmr.msrb.gmra.mxu1 %vm164_vm1, %v154_v39 }
 0x125   :  { %v219_v50 = vpop.f32.mrf.mxu0 }
 0x126   :  { %v250_v46 = vpop.f32.mrf.mxu1  ;;  %v220_v53 = vadd.f32 %v331_v48, %v219_v50 }
 0x127   :  { %v251_v51 = vadd.f32 %v332_v45, %v250_v46 }
 0x129   :  { %v253_v54 = vmul.f32 0.5, %v251_v51 }
 0x12b   :  { %v185_v47 = vpop.f32.mrf.mxu3 }
 0x12c   :  { %v186_v49 = vadd.f32 %v333_v44, %v185_v47 }
 0x12e   :  { %v188_v52 = vmul.f32 0.5, %v186_v49 }
 0x130   :  { %343 = vtanh.f32 %v188_v52 }
 0x131   :  { %345 = vtanh.f32 %v220_v53 }
 0x132   :  { %347 = vtanh.f32 %v253_v54 }
 0x136   :  { %v344_v55 = vpop.eup %343 }
 0x137   :  { %v190_v56 = vadd.f32 1.0, %v344_v55  ;;  %v346_v58 = vpop.eup %345 }
 0x138   :  { %v348_v59 = vpop.eup %347 }
 0x139   :  { %v191_v57 = vmul.f32 0.5, %v190_v56  ;;  %v255_v61 = vadd.f32 1.0, %v348_v59 }
 0x13b   :  { %v257_v60 = vmul.f32 %v346_v58, %v191_v57  ;;  %v256_v62 = vmul.f32 0.5, %v255_v61 }
 0x13d   :  { %349 = vtanh.f32 %v257_v60 }
 0x143   :  { %v350_v63 = vpop.eup %349 }
 0x144   :  { %v259_v0 = vmul.f32 %v350_v63, %v256_v62 }
 0x146   :  { %322 = vmatmul.msk.f32.vlgmr.msrb.gmra.mxu2 %vm164_vm1, %v259_v0 }
 0x1c9   :  { %v288_v2 = vpop.f32.mrf.mxu2 }
 0x1ca   :  { %v289_v3 = vadd.f32 %v334_v1, %v288_v2 }
 0x1cc   :  { %292 = vst.msk [vmem:[#allocation7] sm:$0xff] %vm291_vm2, %v289_v3 }
 0x1cd   :  { %303 = dma.vmem_to_hbm [thread:$0]  %s299_s29, 128, %s301_s8, [#allocation4]  }
 0x1ce   :  { %427 = dma.done.wait [#allocation4], 128  }
 0x1cf   :  { %428 = vsyncadd [#allocation4], 4294967168 }
 0x1d0   :  { %308 = vsyncpa [#allocation3], 1 }
 0x1d1   :  { %309 = vsyncpa [#allocation6], 1 }
 0x1d2   :  { %310 = vsyncpa [#allocation4], 1 }

</bundles_post_ra>
